<compile_context>
chip_gen: v6e
topology: v6e:2x2x1
jax: 0.10.0
libtpu: 0.0.40
codegen_flags: <defaults>
</compile_context>

<pallas_src>
import functools

import jax
import jax.numpy as jnp
from jax.experimental import pallas as pl
from jax.experimental.pallas import tpu as pltpu


def highway_kernel(x_ref, w_ref, b_ref, o_ref, *, embed):
    x = x_ref[...]
    # Single fused MXU matmul: (TB, E) @ (E, 2E) -> (TB, 2E), f32 accumulation.
    h = jnp.dot(x, w_ref[...], preferred_element_type=jnp.float32) + b_ref[...]
    proj = jnp.maximum(h[:, :embed], 0.0)          # relu branch
    gate = jax.nn.sigmoid(h[:, embed:])            # gate branch (EUP exp)
    xf = x.astype(jnp.float32)
    out = xf + gate * (proj - xf)                  # g*p + (1-g)*x, one fewer mul
    o_ref[...] = out.astype(o_ref.dtype)


def prepare_highway_params(w_proj, b_proj, w_gate, b_gate):
    """Fuse PyTorch-convention (out, in) weights once, outside the hot path.

    Returns:
      w_cat: (E, 2E) = [Wp^T | Wg^T]   (matmul-ready, no per-call transpose)
      b_cat: (1, 2E) = [bp | bg]       (f32, broadcast over sublanes)
    """
    E = w_proj.shape[0]
    w_cat = jnp.concatenate([jnp.transpose(w_proj), jnp.transpose(w_gate)], axis=1)
    b_cat = jnp.concatenate([b_proj, b_gate]).reshape(1, 2 * E).astype(jnp.float32)
    return w_cat, b_cat


def highway_forward(x, w_cat, b_cat, *, block_batch=None):
    """x: (B, E). w_cat: (E, 2E). b_cat: (1, 2E)."""
    B, E = x.shape
    assert w_cat.shape == (E, 2 * E), w_cat.shape
    assert b_cat.shape == (1, 2 * E), b_cat.shape

    # --- choose a batch tile: multiple of 8 sublanes, default up to 256 rows.
    tb = block_batch if block_batch is not None else min(256, B)
    tb = min(tb, B)
    if tb >= 8:
        tb = (tb // 8) * 8
    tb = max(tb, 1)

    # Pad batch up to a multiple of the tile (padded rows are sliced off).
    n_blocks = -(-B // tb)
    Bp = n_blocks * tb
    x_in = x if Bp == B else jnp.pad(x, ((0, Bp - B), (0, 0)))

    # --- VMEM budget: resident weights + double-buffered x/out tiles.
    itemsize = jnp.dtype(x.dtype).itemsize
    w_bytes = E * 2 * E * jnp.dtype(w_cat.dtype).itemsize
    tile_bytes = tb * E * itemsize
    needed = 2 * w_bytes + 4 * tile_bytes + 2 * (2 * E) * 4 + tb * 2 * E * 4
    vmem_limit = int(min(64 * 1024 * 1024, max(2 * needed, 16 * 1024 * 1024)))

    out_p = pl.pallas_call(
        functools.partial(highway_kernel, embed=E),
        out_shape=jax.ShapeDtypeStruct((Bp, E), x.dtype),
        grid=(n_blocks,),
        in_specs=[
            pl.BlockSpec((tb, E), lambda i: (i, 0)),        # x: batch-tiled
            pl.BlockSpec((E, 2 * E), lambda i: (0, 0)),     # fused weights: resident
            pl.BlockSpec((1, 2 * E), lambda i: (0, 0)),     # fused bias: resident
        ],
        out_specs=pl.BlockSpec((tb, E), lambda i: (i, 0)),
        compiler_params=pltpu.CompilerParams(
            dimension_semantics=("parallel",),
            vmem_limit_bytes=vmem_limit,
        ),
    )(x_in, w_cat, b_cat)

    return out_p if Bp == B else out_p[:B]


def highway_reference(x, w_proj, b_proj, w_gate, b_gate):
    xproj = jnp.maximum(x @ w_proj.T + b_proj, 0.0)
    gate = jax.nn.sigmoid(x @ w_gate.T + b_gate)
    return gate * xproj + (1.0 - gate) * x


if __name__ == "__main__":
    batch, embed = 512, 128   # lane-dense feature axis (multiple of 128)

    key = jax.random.PRNGKey(0)
    kx, kwp, kbp, kwg, kbg = jax.random.split(key, 5)

    # Deterministic synthetic parameters (nn.Linear(embed, embed) shapes).
    x = jax.random.normal(kx, (batch, embed), dtype=jnp.float32)
    w_proj = jax.random.normal(kwp, (embed, embed), dtype=jnp.float32) * 0.1
    b_proj = jax.random.normal(kbp, (embed,), dtype=jnp.float32) * 0.1
    w_gate = jax.random.normal(kwg, (embed, embed), dtype=jnp.float32) * 0.1
    b_gate = jax.random.normal(kbg, (embed,), dtype=jnp.float32) * 0.1

    # Weight fusion happens once, outside the per-call hot path.
    w_cat, b_cat = prepare_highway_params(w_proj, b_proj, w_gate, b_gate)

    out = highway_forward(x, w_cat, b_cat, block_batch=256)   # grid=(2,)
    out = jax.block_until_ready(out)

    ref = highway_reference(x, w_proj, b_proj, w_gate, b_gate)
    assert out.shape == (batch, embed)
    assert jnp.allclose(out, ref, atol=1e-5, rtol=1e-5), "mismatch vs reference"

    print("KERNEL_OK")
</pallas_src>

<mosaic_0001>
module attributes {stable_mosaic.version = 11 : i64} {
  func.func @highway_kernel(%arg0: i32, %arg1: memref<256x128xf32, #tpu.memory_space<vmem>>, %arg2: memref<128x256xf32, #tpu.memory_space<vmem>>, %arg3: memref<1x256xf32, #tpu.memory_space<vmem>>, %arg4: memref<256x128xf32, #tpu.memory_space<vmem>>) attributes {dimension_semantics = [#tpu.dimension_semantics<parallel>], iteration_bounds = array<i64: 2>, scalar_prefetch = 0 : i64, scratch_operands = 0 : i64, tpu.core_type = #tpu.core_type<tc>, window_params = [{transform_indices = @transform_0, window_bounds = array<i64: 256, 128>}, {pipeline_mode = #tpu.pipeline_mode<synchronous>, transform_indices = @transform_1, window_bounds = array<i64: 128, 256>}, {pipeline_mode = #tpu.pipeline_mode<synchronous>, transform_indices = @transform_2, window_bounds = array<i64: 1, 256>}, {transform_indices = @transform_3, window_bounds = array<i64: 256, 128>}]} {
    %c0 = arith.constant 0 : index
    %c0_0 = arith.constant 0 : index
    %0 = vector.load %arg1[%c0, %c0_0] : memref<256x128xf32, #tpu.memory_space<vmem>>, vector<256x128xf32>
    %c0_1 = arith.constant 0 : index
    %c0_2 = arith.constant 0 : index
    %1 = vector.load %arg2[%c0_1, %c0_2] : memref<128x256xf32, #tpu.memory_space<vmem>>, vector<128x256xf32>
    %cst = arith.constant dense<0.000000e+00> : vector<256x256xf32>
    %2 = tpu.matmul %0, %1, %cst {dimension_numbers = #tpu.dot_dimension_numbers<[1], [0], [0], [1], [0, 0, 1, 1], [], []>} : vector<256x128xf32>, vector<128x256xf32>, vector<256x256xf32> -> vector<256x256xf32>
    %c0_3 = arith.constant 0 : index
    %c0_4 = arith.constant 0 : index
    %3 = vector.load %arg3[%c0_3, %c0_4] : memref<1x256xf32, #tpu.memory_space<vmem>>, vector<1x256xf32>
    %4 = vector.broadcast %3 : vector<1x256xf32> to vector<256x256xf32>
    %5 = arith.addf %2, %4 : vector<256x256xf32>
    %6 = vector.extract_strided_slice %5 {offsets = [0, 0], sizes = [256, 128], strides = [1, 1]} : vector<256x256xf32> to vector<256x128xf32>
    %cst_5 = arith.constant 0.000000e+00 : f32
    %7 = vector.broadcast %cst_5 : f32 to vector<256x128xf32>
    %8 = arith.maximumf %6, %7 : vector<256x128xf32>
    %9 = vector.extract_strided_slice %5 {offsets = [0, 128], sizes = [256, 128], strides = [1, 1]} : vector<256x256xf32> to vector<256x128xf32>
    %10 = arith.negf %9 : vector<256x128xf32>
    %11 = math.exp %10 : vector<256x128xf32>
    %cst_6 = arith.constant 1.000000e+00 : f32
    %12 = vector.broadcast %cst_6 : f32 to vector<256x128xf32>
    %13 = arith.addf %12, %11 : vector<256x128xf32>
    %14 = arith.divf %12, %13 : vector<256x128xf32>
    %15 = arith.subf %8, %0 : vector<256x128xf32>
    %16 = arith.mulf %14, %15 : vector<256x128xf32>
    %17 = arith.addf %0, %16 : vector<256x128xf32>
    %c0_7 = arith.constant 0 : index
    %c0_8 = arith.constant 0 : index
    %18 = vector.load %arg4[%c0_7, %c0_8] : memref<256x128xf32, #tpu.memory_space<vmem>>, vector<256x128xf32>
    tpu.vector_store %arg4[%c0_7, %c0_8], %17 {strides = array<i32>} : memref<256x128xf32, #tpu.memory_space<vmem>>, vector<256x128xf32>,
    return
  }
  func.func @transform_0(%arg0: i32) -> (i32, i32) {
    %c0_i32 = arith.constant 0 : i32
    %c0_i32_0 = arith.constant 0 : i32
    return %arg0, %c0_i32 : i32, i32
  }
  func.func @transform_1(%arg0: i32) -> (i32, i32) {
    %c0_i32 = arith.constant 0 : i32
    %c0_i32_0 = arith.constant 0 : i32
    %c0_i32_1 = arith.constant 0 : i32
    return %c0_i32, %c0_i32_0 : i32, i32
  }
  func.func @transform_2(%arg0: i32) -> (i32, i32) {
    %c0_i32 = arith.constant 0 : i32
    %c0_i32_0 = arith.constant 0 : i32
    %c0_i32_1 = arith.constant 0 : i32
    return %c0_i32, %c0_i32_0 : i32, i32
  }
  func.func @transform_3(%arg0: i32) -> (i32, i32) {
    %c0_i32 = arith.constant 0 : i32
    %c0_i32_0 = arith.constant 0 : i32
    return %arg0, %c0_i32 : i32, i32
  }
}

</mosaic_0001>

<bundles_post_ra>
// kernel: tpu_custom_call.1
= control target key start
LH: loop header
LB: loop body
LE: loop exit
PB: predicated region body
PF: predicated region fallthrough
CT: control target
= control target key end

     0   :  { %8 = vsyncpa [#allocation3], 0  ;;  %s2031_s0 = inlined_call_operand.hbm [shape: f32[512,128], index: 0, kind: input, shape index: {}]   ;;  %s2032_s1 = inlined_call_operand.hbm [shape: f32[128,256], index: 1, kind: input, shape index: {}]   ;;  %s2033_s2 = inlined_call_operand.vmem [shape: f32[1,256], index: 2, kind: input, shape index: {}]   ;;  %s2034_s3 = inlined_call_operand.hbm [shape: f32[512,128], index: 3, kind: output, shape index: {}]  }
   0x1   :  { %10 = vsyncpa [#allocation3 + $0x1], 0 }
   0x2   :  { %11 = vsyncpa [#allocation6], 0 }
   0x3   :  { %12 = vsyncpa [#allocation4], 0 }
   0x4   :  { %14 = vsyncpa [#allocation4 + $0x1], 0  ;;  %s1416_s12 = smov 0   ;;  %s1418_s13 = smov 0  }
   0x5   :  { %s1420_s14 = smov 0   ;;  %s1422_s15 = smov 0  }
   0x6 LB: > { %s1437_s16 = sadd.s32 4294967295, %s1384_s15   ;;  %s988_s17 = sadd.s32 4294967294, %s1384_s15   ;;  %s1384_s15 = sphi %s1422_s15, %s2088_s15   ;;  %s1380_s14 = sphi %s1420_s14, %s2087_s14   ;;  %s1376_s13 = sphi %s1418_s13, %s2086_s13   ;;  %s1372_s12 = sphi %s1416_s12, %s2085_s12  }
   0x7   : > { %p40_p0 = scmp.ne.s32.totalorder %s1376_s13, %s1372_s12  ;;  %p2035_p1 = scmp.eq.s32.totalorder %s1437_s16, 0 }
   0x8   : > { %p112_p3 = scmp.eq.s32.totalorder %s988_s17, 1  ;;  %p989_p5 = scmp.ge.s32.totalorder %s1384_s15, 1 }
   0x9   : > { %p1446_p4 = por %p2035_p1, %p40_p0  ;;  %p119_p7 = scmp.lt.s32.totalorder %s1384_s15, 3 }
   0xa   : > { %p1451_p6 = por %p112_p3, %p40_p0  ;;  %s1386_s21 = smov [#allocation5]  }
   0xb   : > { %s2055_s18 = scalar_select %p1446_p4, 1, 0 }
   0xc   : > { %s2056_s19 = scalar_select %p1451_p6, 1, 0 }
   0xd   : > { %p1456_p8 = pnand %p989_p5, %p119_p7  ;;  %s131_s22 = sshll.u32 %s1386_s21, 4  ;;  %s132_s22 = int_to_ptr.vmem [resolvable:$true] %s131_s22 }
   0xe   : > { %s1470_s24 = sadd.s32 1, %s1384_s15   ;;  %s27_s25 = sadd.s32 1, %s1380_s14 }
   0xf   : > { %s2057_s20 = scalar_select %p1456_p8, 1, 0 }
  0x10   : > { %p1078_p9 = pneg %p1456_p8  ;;  %s24_s26 = ssub.s32 %s1384_s15, %s1470_s24 }
  0x11   : > { %s1273_s27 = scalar_lea.vmem %s132_s22, 4096  ;;  %p1281_p5 = scmp.lt.s32.totalorder %s132_s22, %s132_s22 }
  0x12   : > { %p1465_p11 = pnand %p1078_p9, %p2035_p1  ;;  %p1274_p13 = scmp.ne.s32.totalorder %s132_s22, %s1273_s27 }
  0x13   : > { %p1282_p7 = scmp.lt.s32.totalorder %s1273_s27, %s1273_s27 }
  0x14   : > { %p1264_p12 = pneg %p1465_p11 }
  0x15   : > { %p1283_p10 = por %p1282_p7, %p1281_p5 }
  0x16   : > { %p1276_p0 = pnand %p1274_p13, %p1264_p12 }
  0x18   : > { %p1277_p3 = pneg %p1276_p0 }
  0x1a   : > { %p1284_p2 = pnand %p1283_p10, %p1277_p3 }
  0x1c   : > { %1287 = shalt.err (!%p1284_p2)
}
  0x1d   : > { %s1387_s28 = smov 256   ;;  %s1388_s29 = smov 16  }
  0x1e   : > { %1081 = dma.hbm_to_vmem [thread:$0]  (!%p1465_p11), %s2032_s1, 4096, %s132_s22, [#allocation6], %s1387_s28, %s1387_s28, %s1388_s29  }
  0x1f   : > { %p25_p9 = scmp.eq.s32.totalorder %s24_s26, 0  ;;  %p34_p12 = scmp.ne.s32.totalorder %s1380_s14, %s1376_s13 }
  0x20   : > { %p35_p10 = scmp.eq.s32.totalorder %s1384_s15, 0  ;;  %p1091_p2 = scmp.lt.s32.totalorder %s1384_s15, 2 }
  0x21   : > { %s1487_s5 = scalar_select %p25_p9, %s1380_s14, %s27_s25  }
  0x22   : > { %p36_p13 = por %p35_p10, %p34_p12  ;;  %p2059_p0 = scmp.eq.s32.totalorder %s1437_s16, 1 }
  0x23   : > { %s148_s7 = sand.u32 1, %s1380_s14   ;;  %s1036_s8 = sshll.u32 %s1384_s15, 12 }
  0x24   : > { %p1491_p3 = por %p2059_p0, %p34_p12  ;;  %s992_s9 = sshll.u32 %s148_s7, 8 }
  0x25   : > { %s1500_s17 = scalar_lea.hbm %s2031_s0, %s1036_s8  ;;  %s152_s21 = scalar_lea.vmem [#allocation2], %s992_s9 }
  0x26   : > { %s2060_s6 = scalar_select %p1491_p3, 1, 0 }
  0x27   : > { %s159_s22 = sshll.u32 %s152_s21, 4  ;;  %p1502_p11 = pnand %p1091_p2, %p36_p13  ;;  %s1506_s22 = int_to_ptr.vmem [resolvable:$true] %s159_s22 }
  0x28   : > { %s1508_s25 = scalar_lea.sflag [#allocation3], %s148_s7  ;;  %s1288_s26 = scalar_lea.hbm %s1500_s17, 4096 }
  0x29   : > { %p1289_p5 = scmp.ne.s32.totalorder %s1500_s17, %s1288_s26  ;;  %p1290_p7 = pneg %p1502_p11 }
  0x2a   : > { %s1293_s29 = scalar_lea.hbm %s2031_s0, 8192  ;;  %p1294_p10 = scmp.lt.s32.totalorder %s1500_s17, %s2031_s0 }
  0x2b   : > { %p1291_p9 = pnand %p1290_p7, %p1289_p5  ;;  %p1295_p2 = scmp.lt.s32.totalorder %s1293_s29, %s1288_s26 }
  0x2d   : > { %p1292_p12 = pneg %p1291_p9  ;;  %p1296_p13 = por %p1295_p2, %p1294_p10 }
  0x2f   : > { %p1297_p0 = pnand %p1296_p13, %p1292_p12 }
  0x31   : > { %1300 = shalt.err (!%p1297_p0)
}
  0x32   : > { %s1301_s7 = scalar_lea.vmem %s1506_s22, 4096  ;;  %s1389_s8 = smov [#allocation2]  }
  0x33   : > { %p1302_p1 = scmp.ne.s32.totalorder %s1506_s22, %s1301_s7  ;;  %s1306_s9 = sshll.u32 %s1389_s8, 4  ;;  %s1307_s9 = int_to_ptr.vmem [resolvable:$false] %s1306_s9 }
  0x34   : > { %s1308_s10 = scalar_lea.vmem %s1307_s9, 8192  ;;  %p1309_p9 = scmp.lt.s32.totalorder %s1506_s22, %s1307_s9 }
  0x35   : > { %p1304_p6 = pnand %p1302_p1, %p1290_p7  ;;  %p1310_p3 = scmp.lt.s32.totalorder %s1308_s10, %s1301_s7 }
  0x37   : > { %p1305_p5 = pneg %p1304_p6  ;;  %p1311_p4 = por %p1310_p3, %p1309_p9 }
  0x39   : > { %p1312_p8 = pnand %p1311_p4, %p1305_p5 }
  0x3b   : > { %1315 = shalt.err (!%p1312_p8)
}
  0x3c   : > { %s1390_s11 = smov 128   ;;  %s1391_s21 = smov 8  }
  0x3d   : > { %1085 = dma.hbm_to_vmem [thread:$0]  (!%p1502_p11), %s1500_s17, 4096, %s1506_s22, %s1508_s25, %s1390_s11, %s1390_s11, %s1391_s21  }
  0x3e   : > { %p2062_p1 = scmp.ne.s32.totalorder %s2057_s20, 0 }
  0x40   : > { %171 = sbr.rel (%p2062_p1) target bundleno = 429 (0x1ad), region = 32 }
  0x45   : > { %s1532_s26 = sand.u32 1, %s1376_s13   ;;  %p2063_p4 = scmp.ne.s32.totalorder %s2055_s18, 0 }
  0x46   : > { %s996_s27 = sshll.u32 %s1532_s26, 8  ;;  %s174_s28 = scalar_lea.sflag [#allocation3], %s1532_s26 }
  0x47   : > { %s1538_s29 = scalar_lea.vmem [#allocation2], %s996_s27 }
  0x48   : > { %1359 = dma.done.wait (%p2063_p4), %s174_s28, 4096  }
  0x49   : > { %1361 = vsyncadd (%p2063_p4), %s174_s28, 4294963200  ;;  %p2064_p6 = scmp.eq.s32.totalorder %s1437_s16, 0 }
  0x4b   : > { %1363 = dma.done.wait (%p2064_p6), [#allocation6], 4096   ;;  %p2065_p8 = pmov %p2064_p6 }
  0x4c   : > { %v1392_v0 = vmov 0.0   ;;  %v269_v1 = vld [vmem:[#allocation5 + $0xf8] sm:$0xff]  ;;  %v268_v2 = vld [vmem:[#allocation5 + $0xf0] sm:$0xff]  ;;  %v267_v3 = vld [vmem:[#allocation5 + $0xe8] sm:$0xff]  ;;  %s1805_s17 = scalar_lea.vmem [#allocation7], %s996_s27  ;;  %s1037_s22 = sshll.u32 %s1437_s16, 12 }
  0x4d   : > { %1365 = vsyncadd (%p2065_p8), [#allocation6], 4294963200  ;;  %346 = vmatprep.mubr.f32.mxu0 %v1392_v0  ;;  %442 = vmatprep.mubr.f32.mxu1 %v1392_v0  ;;  %v266_v4 = vld [vmem:[#allocation5 + $0xe0] sm:$0xff]  ;;  %v265_v5 = vld [vmem:[#allocation5 + $0xd8] sm:$0xff]  ;;  %s905_s23 = sshll.u32 %s1805_s17, 4  ;;  %s1983_s4 = scalar_lea.hbm %s2034_s3, %s1037_s22  ;;  %s1985_s23 = int_to_ptr.vmem [resolvable:$true] %s905_s23 }
  0x4e   : > { %282 = vmatprep.subr.mxu0 %v269_v1  ;;  %1038 = vmatprep.subr.mxu1 %v269_v1  ;;  %v264_v6 = vld [vmem:[#allocation5 + $0xd0] sm:$0xff]  ;;  %v263_v7 = vld [vmem:[#allocation5 + $0xc8] sm:$0xff]  ;;  %v262_v8 = vld [vmem:[#allocation5 + $0xc0] sm:$0xff]  ;;  %s892_s16 = scalar_lea.sflag [#allocation4], %s1532_s26  ;;  %s1316_s7 = scalar_lea.vmem %s1985_s23, 4096 }
  0x4f   : > { %283 = vmatpush1.msra.mxu0 %v268_v2  ;;  %1054 = vmatpush1.msra.mxu1 %v268_v2  ;;  %v261_v9 = vld [vmem:[#allocation5 + $0xb8] sm:$0xff]  ;;  %v260_v10 = vld [vmem:[#allocation5 + $0xb0] sm:$0xff]  ;;  %v259_v11 = vld [vmem:[#allocation5 + $0xa8] sm:$0xff]  ;;  %v272_v2 = vlaneseq  ;;  %p1317_p3 = scmp.ne.s32.totalorder %s1985_s23, %s1316_s7  ;;  %p2082_p11 = scmp.ne.s32.totalorder %s2060_s6, 0 }
  0x50   : > { %284 = vmatprep.subr.mxu0 %v267_v3  ;;  %1039 = vmatprep.subr.mxu1 %v267_v3  ;;  %v258_v12 = vld [vmem:[#allocation5 + $0xa0] sm:$0xff]  ;;  %v257_v13 = vld [vmem:[#allocation5 + $0x98] sm:$0xff]  ;;  %v256_v14 = vld [vmem:[#allocation5 + $0x90] sm:$0xff]  ;;  %s1393_s8 = smov [#allocation7]  }
  0x51   : > { %285 = vmatpush1.msra.mxu0 %v266_v4  ;;  %1055 = vmatpush1.msra.mxu1 %v266_v4  ;;  %v255_v15 = vld [vmem:[#allocation5 + $0x88] sm:$0xff]  ;;  %v254_v16 = vld [vmem:[#allocation5 + $0x80] sm:$0xff]  ;;  %v253_v17 = vld [vmem:[#allocation5 + $0x78] sm:$0xff]  ;;  %v273_v3 = vshrl.u32 %v272_v2, 7  ;;  %p1318_p7 = pnand %p1317_p3, %p2082_p11  ;;  %s1320_s9 = sshll.u32 %s1393_s8, 4  ;;  %s1321_s9 = int_to_ptr.vmem [resolvable:$false] %s1320_s9 }
  0x52   : > { %286 = vmatprep.subr.mxu0 %v265_v5  ;;  %1040 = vmatprep.subr.mxu1 %v265_v5  ;;  %v252_v18 = vld [vmem:[#allocation5 + $0x70] sm:$0xff]  ;;  %v251_v19 = vld [vmem:[#allocation5 + $0x68] sm:$0xff]  ;;  %v250_v20 = vld [vmem:[#allocation5 + $0x60] sm:$0xff]  ;;  %s1322_s10 = scalar_lea.vmem %s1321_s9, 8192  ;;  %p1323_p10 = scmp.lt.s32.totalorder %s1985_s23, %s1321_s9 }
  0x53   : > { %287 = vmatpush1.msra.mxu0 %v264_v6  ;;  %1056 = vmatpush1.msra.mxu1 %v264_v6  ;;  %v249_v21 = vld [vmem:[#allocation5 + $0x58] sm:$0xff]  ;;  %v248_v22 = vld [vmem:[#allocation5 + $0x50] sm:$0xff]  ;;  %v247_v23 = vld [vmem:[#allocation5 + $0x48] sm:$0xff]  ;;  %v278_v4 = vsub.s32 1, %v273_v3  ;;  %p1319_p12 = pneg %p1318_p7  ;;  %p1324_p2 = scmp.lt.s32.totalorder %s1322_s10, %s1316_s7 }
  0x54   : > { %288 = vmatprep.subr.mxu0 %v263_v7  ;;  %1041 = vmatprep.subr.mxu1 %v263_v7  ;;  %v246_v24 = vld [vmem:[#allocation5 + $0x40] sm:$0xff]  ;;  %v245_v25 = vld [vmem:[#allocation5 + $0x38] sm:$0xff]  ;;  %v244_v26 = vld [vmem:[#allocation5 + $0x30] sm:$0xff] }
  0x55   : > { %289 = vmatpush1.msra.mxu0 %v262_v8  ;;  %1057 = vmatpush1.msra.mxu1 %v262_v8  ;;  %v243_v27 = vld [vmem:[#allocation5 + $0x28] sm:$0xff]  ;;  %v242_v28 = vld [vmem:[#allocation5 + $0x20] sm:$0xff]  ;;  %v241_v29 = vld [vmem:[#allocation5 + $0x18] sm:$0xff]  ;;  %p1325_p13 = por %p1324_p2, %p1323_p10 }
  0x56   : > { %290 = vmatprep.subr.mxu0 %v261_v9  ;;  %1042 = vmatprep.subr.mxu1 %v261_v9  ;;  %v240_v30 = vld [vmem:[#allocation5 + $0x10] sm:$0xff]  ;;  %v239_v31 = vld [vmem:[#allocation5 + $0x8] sm:$0xff]  ;;  %v238_v32 = vld [vmem:[#allocation5] sm:$0xff] }
  0x57   : > { %291 = vmatpush1.msra.mxu0 %v260_v10  ;;  %1058 = vmatpush1.msra.mxu1 %v260_v10  ;;  %v1551_v33 = vld [vmem:[%s1538_s29] sm:$0xff]  ;;  %v1561_v35 = vld [vmem:[%s1538_s29 + $0x8] sm:$0xff]  ;;  %v1571_v37 = vld [vmem:[%s1538_s29 + $0x10] sm:$0xff]  ;;  %p1326_p0 = pnand %p1325_p13, %p1319_p12 }
  0x58   : > { %292 = vmatprep.subr.mxu0 %v259_v11  ;;  %1043 = vmatprep.subr.mxu1 %v259_v11  ;;  %v1554_v34 = vld [vmem:[%s1538_s29 + $0x80] sm:$0xff]  ;;  %v1564_v36 = vld [vmem:[%s1538_s29 + $0x88] sm:$0xff]  ;;  %v1574_v38 = vld [vmem:[%s1538_s29 + $0x90] sm:$0xff] }
  0x59   : > { %293 = vmatpush1.msra.mxu0 %v258_v12  ;;  %1059 = vmatpush1.msra.mxu1 %v258_v12  ;;  %v1581_v39 = vld [vmem:[%s1538_s29 + $0x18] sm:$0xff]  ;;  %v1591_v41 = vld [vmem:[%s1538_s29 + $0x20] sm:$0xff]  ;;  %v1601_v43 = vld [vmem:[%s1538_s29 + $0x28] sm:$0xff] }
  0x5a   : > { %294 = vmatprep.subr.mxu0 %v257_v13  ;;  %1044 = vmatprep.subr.mxu1 %v257_v13  ;;  %v1584_v40 = vld [vmem:[%s1538_s29 + $0x98] sm:$0xff]  ;;  %v1594_v42 = vld [vmem:[%s1538_s29 + $0xa0] sm:$0xff]  ;;  %v1604_v44 = vld [vmem:[%s1538_s29 + $0xa8] sm:$0xff] }
  0x5b   : > { %295 = vmatpush1.msra.mxu0 %v256_v14  ;;  %1060 = vmatpush1.msra.mxu1 %v256_v14  ;;  %v1611_v45 = vld [vmem:[%s1538_s29 + $0x30] sm:$0xff]  ;;  %v1621_v47 = vld [vmem:[%s1538_s29 + $0x38] sm:$0xff]  ;;  %v1631_v49 = vld [vmem:[%s1538_s29 + $0x40] sm:$0xff] }
  0x5c   : > { %296 = vmatprep.subr.mxu0 %v255_v15  ;;  %1045 = vmatprep.subr.mxu1 %v255_v15  ;;  %v1614_v46 = vld [vmem:[%s1538_s29 + $0xb0] sm:$0xff]  ;;  %v1624_v48 = vld [vmem:[%s1538_s29 + $0xb8] sm:$0xff]  ;;  %v1634_v50 = vld [vmem:[%s1538_s29 + $0xc0] sm:$0xff] }
  0x5d   : > { %297 = vmatpush1.msra.mxu0 %v254_v16  ;;  %1061 = vmatpush1.msra.mxu1 %v254_v16  ;;  %v1641_v51 = vld [vmem:[%s1538_s29 + $0x48] sm:$0xff]  ;;  %v1651_v53 = vld [vmem:[%s1538_s29 + $0x50] sm:$0xff]  ;;  %v1661_v55 = vld [vmem:[%s1538_s29 + $0x58] sm:$0xff] }
  0x5e   : > { %298 = vmatprep.subr.mxu0 %v253_v17  ;;  %1046 = vmatprep.subr.mxu1 %v253_v17  ;;  %v1644_v52 = vld [vmem:[%s1538_s29 + $0xc8] sm:$0xff]  ;;  %v1654_v54 = vld [vmem:[%s1538_s29 + $0xd0] sm:$0xff]  ;;  %v1664_v56 = vld [vmem:[%s1538_s29 + $0xd8] sm:$0xff] }
  0x5f   : > { %299 = vmatpush1.msra.mxu0 %v252_v18  ;;  %1062 = vmatpush1.msra.mxu1 %v252_v18  ;;  %v1671_v57 = vld [vmem:[%s1538_s29 + $0x60] sm:$0xff]  ;;  %v1681_v59 = vld [vmem:[%s1538_s29 + $0x68] sm:$0xff]  ;;  %v1691_v61 = vld [vmem:[%s1538_s29 + $0x70] sm:$0xff] }
  0x60   : > { %300 = vmatprep.subr.mxu0 %v251_v19  ;;  %1047 = vmatprep.subr.mxu1 %v251_v19  ;;  %2066 = vst [vmem:[#allocation11_spill] sm:$0xff] %v1671_v57  ;;  %v1674_v58 = vld [vmem:[%s1538_s29 + $0xe0] sm:$0xff]  ;;  %2068 = vst [vmem:[#allocation13_spill] sm:$0xff] %v1681_v59  ;;  %v1684_v60 = vld [vmem:[%s1538_s29 + $0xe8] sm:$0xff] }
  0x61   : > { %301 = vmatpush1.msra.mxu0 %v250_v20  ;;  %1063 = vmatpush1.msra.mxu1 %v250_v20  ;;  %2067 = vst [vmem:[#allocation12_spill] sm:$0xff] %v1674_v58  ;;  %2069 = vst [vmem:[#allocation14_spill] sm:$0xff] %v1684_v60  ;;  %v1694_v62 = vld [vmem:[%s1538_s29 + $0xf0] sm:$0xff]  ;;  %v1701_v63 = vld [vmem:[%s1538_s29 + $0x78] sm:$0xff] }
  0x62   : > { %302 = vmatprep.subr.mxu0 %v249_v21  ;;  %1048 = vmatprep.subr.mxu1 %v249_v21  ;;  %2070 = vst [vmem:[#allocation15_spill] sm:$0xff] %v1691_v61  ;;  %2071 = vst [vmem:[#allocation16_spill] sm:$0xff] %v1694_v62  ;;  %v1704_v1 = vld [vmem:[%s1538_s29 + $0xf8] sm:$0xff]  ;;  %v270_v5 = vld [vmem:[%s2033_s2] sm:$0x3] }
  0x63   : > { %303 = vmatpush1.msra.mxu0 %v248_v22  ;;  %1064 = vmatpush1.msra.mxu1 %v248_v22  ;;  %2072 = vst [vmem:[#allocation17_spill] sm:$0xff] %v1701_v63  ;;  %2073 = vst [vmem:[#allocation18_spill] sm:$0xff] %v1704_v1  ;;  %v1711_v6 = vrot.slane %v270_v5, %v278_v4 }
  0x64   : > { %304 = vmatprep.subr.mxu0 %v247_v23  ;;  %1049 = vmatprep.subr.mxu1 %v247_v23 }
  0x65   : > { %305 = vmatpush1.msra.mxu0 %v246_v24  ;;  %1065 = vmatpush1.msra.mxu1 %v246_v24 }
  0x66   : > { %306 = vmatprep.subr.mxu0 %v245_v25  ;;  %1050 = vmatprep.subr.mxu1 %v245_v25 }
  0x67   : > { %307 = vmatpush1.msra.mxu0 %v244_v26  ;;  %1066 = vmatpush1.msra.mxu1 %v244_v26 }
  0x68   : > { %308 = vmatprep.subr.mxu0 %v243_v27  ;;  %1051 = vmatprep.subr.mxu1 %v243_v27 }
  0x69   : > { %309 = vmatpush1.msra.mxu0 %v242_v28  ;;  %1067 = vmatpush1.msra.mxu1 %v242_v28 }
  0x6a   : > { %310 = vmatprep.subr.mxu0 %v241_v29  ;;  %1052 = vmatprep.subr.mxu1 %v241_v29 }
  0x6b   : > { %311 = vmatpush1.msra.mxu0 %v240_v30  ;;  %1068 = vmatpush1.msra.mxu1 %v240_v30 }
  0x6c   : > { %312 = vmatprep.subr.mxu0 %v239_v31  ;;  %1053 = vmatprep.subr.mxu1 %v239_v31  ;;  %v274_v31 = vsub.s32 0, %v273_v3 }
  0x6d   : > { %313 = vmatpush1.msra.mxu0 %v238_v32  ;;  %1069 = vmatpush1.msra.mxu1 %v238_v32 }
  0x6e   : > { %347 = vmatmul.mubr.f32.vlgmr.msra.gmra.mxu0 %v1551_v33  ;;  %443 = vmatmul.mubr.f32.vlgmr.msra.gmra.mxu1 %v1554_v34 }
  0x6f   : > { %352 = vmatprep.mubr.f32.mxu0 %v1392_v0  ;;  %448 = vmatprep.mubr.f32.mxu1 %v1392_v0 }
  0x72   : > { %353 = vmatmul.mubr.f32.gmra.mxu0 %v1561_v35  ;;  %449 = vmatmul.mubr.f32.gmra.mxu1 %v1564_v36 }
  0x73   : > { %358 = vmatprep.mubr.f32.mxu0 %v1392_v0  ;;  %454 = vmatprep.mubr.f32.mxu1 %v1392_v0 }
  0x76   : > { %359 = vmatmul.mubr.f32.gmra.mxu0 %v1571_v37  ;;  %455 = vmatmul.mubr.f32.gmra.mxu1 %v1574_v38 }
  0x77   : > { %364 = vmatprep.mubr.f32.mxu0 %v1392_v0  ;;  %460 = vmatprep.mubr.f32.mxu1 %v1392_v0 }
  0x7a   : > { %365 = vmatmul.mubr.f32.gmra.mxu0 %v1581_v39  ;;  %461 = vmatmul.mubr.f32.gmra.mxu1 %v1584_v40 }
  0x7b   : > { %370 = vmatprep.mubr.f32.mxu0 %v1392_v0  ;;  %466 = vmatprep.mubr.f32.mxu1 %v1392_v0 }
  0x7e   : > { %371 = vmatmul.mubr.f32.gmra.mxu0 %v1591_v41  ;;  %467 = vmatmul.mubr.f32.gmra.mxu1 %v1594_v42 }
  0x7f   : > { %376 = vmatprep.mubr.f32.mxu0 %v1392_v0  ;;  %472 = vmatprep.mubr.f32.mxu1 %v1392_v0 }
  0x82   : > { %377 = vmatmul.mubr.f32.gmra.mxu0 %v1601_v43  ;;  %473 = vmatmul.mubr.f32.gmra.mxu1 %v1604_v44 }
  0x83   : > { %382 = vmatprep.mubr.f32.mxu0 %v1392_v0  ;;  %478 = vmatprep.mubr.f32.mxu1 %v1392_v0 }
  0x86   : > { %383 = vmatmul.mubr.f32.gmra.mxu0 %v1611_v45  ;;  %479 = vmatmul.mubr.f32.gmra.mxu1 %v1614_v46 }
  0x87   : > { %388 = vmatprep.mubr.f32.mxu0 %v1392_v0  ;;  %484 = vmatprep.mubr.f32.mxu1 %v1392_v0 }
  0x8a   : > { %389 = vmatmul.mubr.f32.gmra.mxu0 %v1621_v47  ;;  %485 = vmatmul.mubr.f32.gmra.mxu1 %v1624_v48 }
  0x8b   : > { %394 = vmatprep.mubr.f32.mxu0 %v1392_v0  ;;  %490 = vmatprep.mubr.f32.mxu1 %v1392_v0 }
  0x8e   : > { %395 = vmatmul.mubr.f32.gmra.mxu0 %v1631_v49  ;;  %491 = vmatmul.mubr.f32.gmra.mxu1 %v1634_v50 }
  0x8f   : > { %400 = vmatprep.mubr.f32.mxu0 %v1392_v0  ;;  %496 = vmatprep.mubr.f32.mxu1 %v1392_v0 }
  0x92   : > { %401 = vmatmul.mubr.f32.gmra.mxu0 %v1641_v51  ;;  %497 = vmatmul.mubr.f32.gmra.mxu1 %v1644_v52 }
  0x93   : > { %406 = vmatprep.mubr.f32.mxu0 %v1392_v0  ;;  %502 = vmatprep.mubr.f32.mxu1 %v1392_v0 }
  0x96   : > { %407 = vmatmul.mubr.f32.gmra.mxu0 %v1651_v53  ;;  %503 = vmatmul.mubr.f32.gmra.mxu1 %v1654_v54 }
  0x97   : > { %412 = vmatprep.mubr.f32.mxu0 %v1392_v0  ;;  %508 = vmatprep.mubr.f32.mxu1 %v1392_v0 }
  0x9a   : > { %413 = vmatmul.mubr.f32.gmra.mxu0 %v1661_v55  ;;  %509 = vmatmul.mubr.f32.gmra.mxu1 %v1664_v56 }
  0x9b   : > { %418 = vmatprep.mubr.f32.mxu0 %v1392_v0  ;;  %514 = vmatprep.mubr.f32.mxu1 %v1392_v0 }
  0x9e   : > { %419 = vmatmul.mubr.f32.gmra.mxu0 %v1671_v57  ;;  %515 = vmatmul.mubr.f32.gmra.mxu1 %v1674_v58 }
  0x9f   : > { %424 = vmatprep.mubr.f32.mxu0 %v1392_v0  ;;  %520 = vmatprep.mubr.f32.mxu1 %v1392_v0 }
  0xa2   : > { %425 = vmatmul.mubr.f32.gmra.mxu0 %v1681_v59  ;;  %521 = vmatmul.mubr.f32.gmra.mxu1 %v1684_v60 }
  0xa3   : > { %430 = vmatprep.mubr.f32.mxu0 %v1392_v0  ;;  %526 = vmatprep.mubr.f32.mxu1 %v1392_v0 }
  0xa6   : > { %431 = vmatmul.mubr.f32.gmra.mxu0 %v1691_v61  ;;  %527 = vmatmul.mubr.f32.gmra.mxu1 %v1694_v62 }
  0xa7   : > { %436 = vmatprep.mubr.f32.mxu0 %v1392_v0  ;;  %532 = vmatprep.mubr.f32.mxu1 %v1392_v0 }
  0xaa   : > { %437 = vmatmul.mubr.f32.gmra.mxu0 %v1701_v63  ;;  %533 = vmatmul.mubr.f32.gmra.mxu1 %v1704_v1 }
 0x12e   : > { %v348_v7 = vpop.f32.mrf.mxu0  ;;  %v1713_v8 = vpop.f32.mrf.mxu1 }
 0x130   : > { %v350_v0 = vpop.f32.mrf.mxu0  ;;  %v446_v9 = vpop.f32.mrf.mxu1 }
 0x131   : > { %v351_v10 = vadd.f32 %v350_v0, %v1711_v6  ;;  %v447_v11 = vadd.f32 %v446_v9, %v1711_v6 }
 0x132   : > { %v1717_v12 = vpop.f32.mrf.mxu0  ;;  %v1719_v13 = vpop.f32.mrf.mxu1 }
 0x133   : > { %v999_v14 = vmul.f32 -1.442695, %v351_v10  ;;  %v1015_v15 = vmul.f32 -1.442695, %v447_v11 }
 0x134   : > { %v356_v16 = vpop.f32.mrf.mxu0  ;;  %v452_v17 = vpop.f32.mrf.mxu1 }
 0x135   : > { %1134 = vpow2.f32 %v999_v14  ;;  %v357_v18 = vadd.f32 %v356_v16, %v1711_v6  ;;  %v453_v19 = vadd.f32 %v452_v17, %v1711_v6  ;;  %v1739_v16 = vrot.slane %v270_v5, %v274_v31 }
 0x136   : > { %1136 = vpow2.f32 %v1015_v15  ;;  %v1723_v20 = vpop.f32.mrf.mxu0  ;;  %v1725_v21 = vpop.f32.mrf.mxu1 }
 0x137   : > { %v1000_v22 = vmul.f32 -1.442695, %v357_v18  ;;  %v1016_v23 = vmul.f32 -1.442695, %v453_v19 }
 0x138   : > { %v362_v24 = vpop.f32.mrf.mxu0  ;;  %v458_v25 = vpop.f32.mrf.mxu1 }
 0x139   : > { %1138 = vpow2.f32 %v1000_v22  ;;  %v363_v26 = vadd.f32 %v362_v24, %v1711_v6  ;;  %v459_v27 = vadd.f32 %v458_v25, %v1711_v6 }
 0x13a   : > { %1140 = vpow2.f32 %v1016_v23  ;;  %v1729_v28 = vpop.f32.mrf.mxu0  ;;  %v1731_v29 = vpop.f32.mrf.mxu1 }
 0x13b   : > { %v1001_v30 = vmul.f32 -1.442695, %v363_v26  ;;  %v1017_v32 = vmul.f32 -1.442695, %v459_v27 }
 0x13c   : > { %v368_v2 = vpop.f32.mrf.mxu0  ;;  %v464_v4 = vpop.f32.mrf.mxu1 }
 0x13d   : > { %1142 = vpow2.f32 %v1001_v30  ;;  %v369_v0 = vadd.f32 %v368_v2, %v1711_v6  ;;  %v465_v9 = vadd.f32 %v464_v4, %v1711_v6  ;;  %v349_v30 = vadd.f32 %v348_v7, %v1739_v16 }
 0x13e   : > { %1144 = vpow2.f32 %v1017_v32  ;;  %v1735_v10 = vpop.f32.mrf.mxu0  ;;  %v1737_v11 = vpop.f32.mrf.mxu1 }
 0x13f   : > { %v1002_v14 = vmul.f32 -1.442695, %v369_v0  ;;  %v1018_v15 = vmul.f32 -1.442695, %v465_v9  ;;  %v373_v57 = vadd.f32 %v1735_v10, %v1739_v16 }
 0x140   : > { %v374_v17 = vpop.f32.mrf.mxu0  ;;  %v470_v18 = vpop.f32.mrf.mxu1 }
 0x141   : > { %1146 = vpow2.f32 %v1002_v14  ;;  %v375_v3 = vadd.f32 %v374_v17, %v1711_v6  ;;  %v471_v19 = vadd.f32 %v470_v18, %v1711_v6  ;;  %v445_v18 = vadd.f32 %v1713_v8, %v1739_v16 }
 0x142   : > { %v1135_v22 = vpop.eup %1134  ;;  %1148 = vpow2.f32 %v1018_v15  ;;  %v1743_v23 = vpop.f32.mrf.mxu0  ;;  %v361_v8 = vadd.f32 %v1723_v20, %v1739_v16 }
 0x143   : > { %v1745_v24 = vpop.f32.mrf.mxu1  ;;  %v1137_v25 = vpop.eup %1136  ;;  %v667_v26 = vadd.f32 1.0, %v1135_v22  ;;  %v1003_v27 = vmul.f32 -1.442695, %v375_v3  ;;  %v1019_v31 = vmul.f32 -1.442695, %v471_v19  ;;  %v539_v19 = vmax.f32 %v349_v30, 0.0 }
 0x144   : > { %v683_v5 = vadd.f32 1.0, %v1137_v25  ;;  %v380_v32 = vpop.f32.mrf.mxu0  ;;  %v541_v60 = vmax.f32 %v361_v8, 0.0 }
 0x145   : > { %v476_v2 = vpop.f32.mrf.mxu1  ;;  %1150 = vrcp.f32 %v667_v26  ;;  %v381_v4 = vadd.f32 %v380_v32, %v1711_v6  ;;  %v763_v20 = vsub.f32 %v539_v19, %v1551_v33  ;;  %v367_v19 = vadd.f32 %v1729_v28, %v1739_v16 }
 0x146   : > { %v477_v0 = vadd.f32 %v476_v2, %v1711_v6  ;;  %v1139_v9 = vpop.eup %1138  ;;  %1152 = vrcp.f32 %v683_v5  ;;  %v1750_v14 = vpop.f32.mrf.mxu0  ;;  %v355_v5 = vadd.f32 %v1717_v12, %v1739_v16  ;;  %v451_v2 = vadd.f32 %v1719_v13, %v1739_v16 }
 0x147   : > { %v1752_v15 = vpop.f32.mrf.mxu1  ;;  %v1141_v17 = vpop.eup %1140  ;;  %v668_v7 = vadd.f32 1.0, %v1139_v9  ;;  %1154 = vpow2.f32 %v1003_v27  ;;  %v1004_v3 = vmul.f32 -1.442695, %v381_v4  ;;  %v457_v12 = vadd.f32 %v1725_v21, %v1739_v16 }
 0x148   : > { %v684_v22 = vadd.f32 1.0, %v1141_v17  ;;  %1156 = vpow2.f32 %v1019_v31  ;;  %v1020_v25 = vmul.f32 -1.442695, %v477_v0  ;;  %v386_v26 = vpop.f32.mrf.mxu0  ;;  %v555_v0 = vmax.f32 %v445_v18, 0.0 }
 0x149   : > { %v482_v32 = vpop.f32.mrf.mxu1  ;;  %1158 = vrcp.f32 %v668_v7  ;;  %v387_v1 = vadd.f32 %v386_v26, %v1711_v6  ;;  %v556_v62 = vmax.f32 %v451_v2, 0.0  ;;  %v557_v2 = vmax.f32 %v457_v12, 0.0 }
 0x14a   : > { %v1143_v63 = vpop.eup %1142  ;;  %1160 = vrcp.f32 %v684_v22  ;;  %v483_v27 = vadd.f32 %v482_v32, %v1711_v6  ;;  %v1764_v30 = vpop.f32.mrf.mxu0  ;;  %v540_v32 = vmax.f32 %v355_v5, 0.0  ;;  %v1785_v28 = vadd.f32 %v1731_v29, %v1739_v16 }
 0x14b   : > { %v1766_v31 = vpop.f32.mrf.mxu1  ;;  %v1145_v4 = vpop.eup %1144  ;;  %v669_v13 = vadd.f32 1.0, %v1143_v63  ;;  %1162 = vpow2.f32 %v1004_v3  ;;  %v1005_v17 = vmul.f32 -1.442695, %v387_v1 }
 0x14c   : > { %v685_v9 = vadd.f32 1.0, %v1145_v4  ;;  %1164 = vpow2.f32 %v1020_v25  ;;  %v1021_v7 = vmul.f32 -1.442695, %v483_v27  ;;  %v392_v22 = vpop.f32.mrf.mxu0  ;;  %v779_v25 = vsub.f32 %v555_v0, %v1554_v34 }
 0x14d   : > { %v488_v26 = vpop.f32.mrf.mxu1  ;;  %1166 = vrcp.f32 %v669_v13  ;;  %v393_v18 = vadd.f32 %v392_v22, %v1711_v6  ;;  %v780_v22 = vsub.f32 %v556_v62, %v1564_v36  ;;  %v765_v0 = vsub.f32 %v541_v60, %v1571_v37 }
 0x14e   : > { %v1147_v61 = vpop.eup %1146  ;;  %1168 = vrcp.f32 %v685_v9  ;;  %v489_v21 = vadd.f32 %v488_v26, %v1711_v6  ;;  %v1773_v63 = vpop.f32.mrf.mxu0  ;;  %v764_v9 = vsub.f32 %v540_v32, %v1561_v35  ;;  %v781_v60 = vsub.f32 %v557_v2, %v1574_v38 }
 0x14f   : > { %v1775_v3 = vpop.f32.mrf.mxu1  ;;  %v1149_v1 = vpop.eup %1148  ;;  %v670_v5 = vadd.f32 1.0, %v1147_v61  ;;  %1170 = vpow2.f32 %v1005_v17  ;;  %v1006_v8 = vmul.f32 -1.442695, %v393_v18  ;;  %v542_v18 = vmax.f32 %v367_v19, 0.0 }
 0x150   : > { %v686_v27 = vadd.f32 1.0, %v1149_v1  ;;  %1172 = vpow2.f32 %v1021_v7  ;;  %v398_v4 = vpop.f32.mrf.mxu0  ;;  %v1022_v26 = vmul.f32 -1.442695, %v489_v21 }
 0x151   : > { %v494_v13 = vpop.f32.mrf.mxu1  ;;  %1174 = vrcp.f32 %v670_v5  ;;  %v399_v61 = vadd.f32 %v398_v4, %v1711_v6  ;;  %v766_v10 = vsub.f32 %v542_v18, %v1581_v39  ;;  %v543_v18 = vmax.f32 %v373_v57, 0.0 }
 0x152   : > { %v1151_v59 = vpop.eup %1150  ;;  %1176 = vrcp.f32 %v686_v27  ;;  %v1788_v12 = vpop.f32.mrf.mxu0  ;;  %v495_v62 = vadd.f32 %v494_v13, %v1711_v6 }
 0x153   : > { %v1790_v17 = vpop.f32.mrf.mxu1  ;;  %v1153_v7 = vpop.eup %1152  ;;  %v795_v32 = vmul.f32 %v1151_v59, %v763_v20  ;;  %1178 = vpow2.f32 %v1006_v8  ;;  %v1007_v29 = vmul.f32 -1.442695, %v399_v61 }
 0x154   : > { %v1155_v21 = vpop.eup %1154  ;;  %v811_v1 = vmul.f32 %v1153_v7, %v779_v25  ;;  %1180 = vpow2.f32 %v1022_v26  ;;  %v404_v5 = vpop.f32.mrf.mxu0  ;;  %v1023_v20 = vmul.f32 -1.442695, %v495_v62  ;;  %v558_v25 = vmax.f32 %v1785_v28, 0.0 }
 0x155   : > { %v500_v27 = vpop.f32.mrf.mxu1  ;;  %v1157_v4 = vpop.eup %1156  ;;  %v827_v58 = vadd.f32 %v795_v32, %v1551_v33  ;;  %v671_v59 = vadd.f32 1.0, %v1155_v21  ;;  %1182 = vpow2.f32 %v1007_v29  ;;  %v405_v32 = vadd.f32 %v404_v5, %v1711_v6 }
 0x156   : > { %v1159_v19 = vpop.eup %1158  ;;  %v843_v8 = vadd.f32 %v811_v1, %v1554_v34  ;;  %v687_v13 = vadd.f32 1.0, %v1157_v4  ;;  %v1799_v2 = vpop.f32.mrf.mxu0  ;;  %v1811_v34 = vadd.f32 %v1737_v11, %v1739_v16  ;;  %v501_v62 = vadd.f32 %v500_v27, %v1711_v6 }
 0x157   : > { %v1801_v26 = vpop.f32.mrf.mxu1  ;;  %v1161_v61 = vpop.eup %1160  ;;  %859 = vst [vmem:[%s1805_s17] sm:$0xff] %v827_v58  ;;  %v796_v33 = vmul.f32 %v1159_v19, %v764_v9  ;;  %1184 = vrcp.f32 %v671_v59  ;;  %v1008_v5 = vmul.f32 -1.442695, %v405_v32 }
 0x158   : > { %v1163_v28 = vpop.eup %1162  ;;  %875 = vst [vmem:[%s1805_s17 + $0x80] sm:$0xff] %v843_v8  ;;  %v812_v7 = vmul.f32 %v1161_v61, %v780_v22  ;;  %1186 = vrcp.f32 %v687_v13  ;;  %v410_v21 = vpop.f32.mrf.mxu0  ;;  %v379_v22 = vadd.f32 %v1743_v23, %v1739_v16  ;;  %v1024_v57 = vmul.f32 -1.442695, %v501_v62 }
 0x159   : > { %v506_v1 = vpop.f32.mrf.mxu1  ;;  %v1165_v58 = vpop.eup %1164  ;;  %v828_v9 = vadd.f32 %v796_v33, %v1561_v35  ;;  %v672_v29 = vadd.f32 1.0, %v1163_v28  ;;  %1188 = vpow2.f32 %v1023_v20  ;;  %v475_v35 = vadd.f32 %v1745_v24, %v1739_v16 }
 0x15a   : > { %v1167_v11 = vpop.eup %1166  ;;  %v844_v4 = vadd.f32 %v812_v7, %v1564_v36  ;;  %v688_v59 = vadd.f32 1.0, %v1165_v58  ;;  %v1820_v19 = vpop.f32.mrf.mxu0  ;;  %v782_v61 = vsub.f32 %v558_v25, %v1584_v40  ;;  %v559_v23 = vmax.f32 %v1811_v34, 0.0 }
 0x15b   : > { %v1822_v27 = vpop.f32.mrf.mxu1  ;;  %v1169_v8 = vpop.eup %1168  ;;  %860 = vst [vmem:[%s1805_s17 + $0x8] sm:$0xff] %v828_v9  ;;  %v797_v13 = vmul.f32 %v1167_v11, %v765_v0  ;;  %1190 = vrcp.f32 %v672_v29  ;;  %v767_v0 = vsub.f32 %v543_v18, %v1591_v41 }
 0x15c   : > { %v1171_v20 = vpop.eup %1170  ;;  %876 = vst [vmem:[%s1805_s17 + $0x88] sm:$0xff] %v844_v4  ;;  %v813_v36 = vmul.f32 %v1169_v8, %v781_v60  ;;  %1192 = vrcp.f32 %v688_v59  ;;  %v416_v33 = vpop.f32.mrf.mxu0  ;;  %v544_v60 = vmax.f32 %v379_v22, 0.0  ;;  %v560_v4 = vmax.f32 %v475_v35, 0.0 }
 0x15d   : > { %v512_v28 = vpop.f32.mrf.mxu1  ;;  %v1173_v7 = vpop.eup %1172  ;;  %v829_v32 = vadd.f32 %v797_v13, %v1571_v37  ;;  %v673_v58 = vadd.f32 1.0, %v1171_v20  ;;  %1194 = vpow2.f32 %v1008_v5  ;;  %v411_v37 = vadd.f32 %v410_v21, %v1711_v6 }
 0x15e   : > { %v1175_v24 = vpop.eup %1174  ;;  %v845_v62 = vadd.f32 %v813_v36, %v1574_v38  ;;  %v689_v9 = vadd.f32 1.0, %v1173_v7  ;;  %1196 = vpow2.f32 %v1024_v57  ;;  %v1833_v25 = vpop.f32.mrf.mxu0  ;;  %v385_v38 = vadd.f32 %v1750_v14, %v1739_v16 }
 0x15f   : > { %v1835_v34 = vpop.f32.mrf.mxu1  ;;  %v1177_v29 = vpop.eup %1176  ;;  %861 = vst [vmem:[%s1805_s17 + $0x10] sm:$0xff] %v829_v32  ;;  %v798_v11 = vmul.f32 %v1175_v24, %v766_v10  ;;  %1198 = vrcp.f32 %v673_v58  ;;  %v507_v22 = vadd.f32 %v506_v1, %v1711_v6  ;;  %v1846_v10 = vadd.f32 %v1752_v15, %v1739_v16 }
 0x160   : > { %v1179_v18 = vpop.eup %1178  ;;  %877 = vst [vmem:[%s1805_s17 + $0x90] sm:$0xff] %v845_v62  ;;  %v814_v59 = vmul.f32 %v1177_v29, %v782_v61  ;;  %1200 = vrcp.f32 %v689_v9  ;;  %v422_v5 = vpop.f32.mrf.mxu0  ;;  %v1009_v35 = vmul.f32 -1.442695, %v411_v37  ;;  %v783_v14 = vsub.f32 %v559_v23, %v1594_v42 }
 0x161   : > { %v518_v8 = vpop.f32.mrf.mxu1  ;;  %v1181_v13 = vpop.eup %1180  ;;  %v830_v57 = vadd.f32 %v798_v11, %v1581_v39  ;;  %v674_v21 = vadd.f32 1.0, %v1179_v18  ;;  %v768_v36 = vsub.f32 %v544_v60, %v1601_v43  ;;  %v1025_v39 = vmul.f32 -1.442695, %v507_v22 }
 0x162   : > { %v846_v20 = vadd.f32 %v814_v59, %v1584_v40  ;;  %v690_v61 = vadd.f32 1.0, %v1181_v13  ;;  %v1851_v1 = vpop.f32.mrf.mxu0  ;;  %v1183_v32 = vpop.eup %1182  ;;  %v417_v15 = vadd.f32 %v416_v33, %v1711_v6  ;;  %v513_v58 = vadd.f32 %v512_v28, %v1711_v6 }
 0x163   : > { %v1853_v7 = vpop.f32.mrf.mxu1  ;;  %862 = vst [vmem:[%s1805_s17 + $0x18] sm:$0xff] %v830_v57  ;;  %1202 = vrcp.f32 %v674_v21  ;;  %v784_v40 = vsub.f32 %v560_v4, %v1604_v44  ;;  %v545_v23 = vmax.f32 %v385_v38, 0.0  ;;  %v675_v62 = vadd.f32 1.0, %v1183_v32 }
 0x164   : > { %v1185_v24 = vpop.eup %1184  ;;  %878 = vst [vmem:[%s1805_s17 + $0x98] sm:$0xff] %v846_v20  ;;  %1204 = vrcp.f32 %v690_v61  ;;  %v428_v60 = vpop.f32.mrf.mxu0  ;;  %v561_v11 = vmax.f32 %v1846_v10, 0.0  ;;  %v1010_v37 = vmul.f32 -1.442695, %v417_v15  ;;  %v391_v28 = vadd.f32 %v1764_v30, %v1739_v16 }
 0x165   : > { %v1187_v9 = vpop.eup %1186  ;;  %v799_v29 = vmul.f32 %v1185_v24, %v767_v0  ;;  %1206 = vpow2.f32 %v1009_v35  ;;  %v524_v18 = vpop.f32.mrf.mxu1  ;;  %v1026_v22 = vmul.f32 -1.442695, %v513_v58  ;;  %v487_v38 = vadd.f32 %v1766_v31, %v1739_v16 }
 0x166   : > { %v1189_v59 = vpop.eup %1188  ;;  %v815_v33 = vmul.f32 %v1187_v9, %v783_v14  ;;  %1208 = vrcp.f32 %v675_v62  ;;  %v769_v10 = vsub.f32 %v545_v23, %v1611_v45  ;;  %v423_v21 = vadd.f32 %v422_v5, %v1711_v6  ;;  %v1869_v35 = vpop.f32.mrf.mxu0 }
 0x167   : > { %v831_v4 = vadd.f32 %v799_v29, %v1591_v41  ;;  %v691_v13 = vadd.f32 1.0, %v1189_v59  ;;  %1210 = vpow2.f32 %v1025_v39  ;;  %v397_v41 = vadd.f32 %v1773_v63, %v1739_v16  ;;  %v1875_v14 = vpop.f32.mrf.mxu1 }
 0x168   : > { %v1191_v0 = vpop.eup %1190  ;;  %v847_v57 = vadd.f32 %v815_v33, %v1594_v42  ;;  %1212 = vpow2.f32 %v1010_v37  ;;  %v519_v31 = vadd.f32 %v518_v8, %v1711_v6  ;;  %v546_v32 = vmax.f32 %v391_v28, 0.0  ;;  %v434_v9 = vpop.f32.mrf.mxu0 }
 0x169   : > { %v1193_v30 = vpop.eup %1192  ;;  %863 = vst [vmem:[%s1805_s17 + $0x20] sm:$0xff] %v831_v4  ;;  %v800_v20 = vmul.f32 %v1191_v0, %v768_v36  ;;  %1214 = vrcp.f32 %v691_v13  ;;  %v1011_v5 = vmul.f32 -1.442695, %v423_v21  ;;  %v562_v58 = vmax.f32 %v487_v38, 0.0 }
 0x16a   : > { %v1195_v61 = vpop.eup %1194  ;;  %879 = vst [vmem:[%s1805_s17 + $0xa0] sm:$0xff] %v847_v57  ;;  %v816_v42 = vmul.f32 %v1193_v30, %v784_v40  ;;  %1216 = vpow2.f32 %v1026_v22  ;;  %v1027_v24 = vmul.f32 -1.442695, %v519_v31  ;;  %v785_v8 = vsub.f32 %v561_v11, %v1614_v46 }
 0x16b   : > { %v1197_v39 = vpop.eup %1196  ;;  %v832_v15 = vadd.f32 %v800_v20, %v1601_v43  ;;  %v676_v36 = vadd.f32 1.0, %v1195_v61  ;;  %1218 = vpow2.f32 %v1011_v5  ;;  %v547_v37 = vmax.f32 %v397_v41, 0.0  ;;  %v530_v43 = vpop.f32.mrf.mxu1 }
 0x16c   : > { %v1199_v63 = vpop.eup %1198  ;;  %v848_v23 = vadd.f32 %v816_v42, %v1604_v44  ;;  %v692_v62 = vadd.f32 1.0, %v1197_v39  ;;  %v493_v59 = vadd.f32 %v1775_v3, %v1739_v16  ;;  %v429_v44 = vadd.f32 %v428_v60, %v1711_v6 }
 0x16d   : > { %v1201_v40 = vpop.eup %1200  ;;  %864 = vst [vmem:[%s1805_s17 + $0x28] sm:$0xff] %v832_v15  ;;  %v801_v29 = vmul.f32 %v1199_v63, %v769_v10  ;;  %1220 = vrcp.f32 %v676_v36  ;;  %v525_v11 = vadd.f32 %v524_v18, %v1711_v6  ;;  %v770_v22 = vsub.f32 %v546_v32, %v1621_v47  ;;  %v1893_v10 = vpop.f32.mrf.mxu0 }
 0x16e   : > { %880 = vst [vmem:[%s1805_s17 + $0xa8] sm:$0xff] %v848_v23  ;;  %v817_v33 = vmul.f32 %v1201_v40, %v785_v8  ;;  %1222 = vrcp.f32 %v692_v62  ;;  %v786_v4 = vsub.f32 %v562_v58, %v1624_v48  ;;  %v403_v13 = vadd.f32 %v1788_v12, %v1739_v16  ;;  %v1898_v20 = vpop.f32.mrf.mxu1 }
 0x16f   : > { %v833_v28 = vadd.f32 %v801_v29, %v1611_v45  ;;  %1224 = vpow2.f32 %v1027_v24  ;;  %v1012_v0 = vmul.f32 -1.442695, %v429_v44  ;;  %v1028_v57 = vmul.f32 -1.442695, %v525_v11  ;;  %v440_v24 = vpop.f32.mrf.mxu0 }
 0x170   : > { %v1203_v38 = vpop.eup %1202  ;;  %v849_v3 = vadd.f32 %v817_v33, %v1614_v46  ;;  %v771_v45 = vsub.f32 %v547_v37, %v1631_v49  ;;  %v563_v21 = vmax.f32 %v493_v59, 0.0  ;;  %v435_v30 = vadd.f32 %v434_v9, %v1711_v6  ;;  %v536_v62 = vpop.f32.mrf.mxu1 }
 0x171   : > { %v1205_v60 = vpop.eup %1204  ;;  %865 = vst [vmem:[%s1805_s17 + $0x30] sm:$0xff] %v833_v28  ;;  %v802_v18 = vmul.f32 %v1203_v38, %v770_v22  ;;  %v499_v12 = vadd.f32 %v1790_v17, %v1739_v16  ;;  %1226 = vpow2.f32 %v1012_v0  ;;  %v531_v31 = vadd.f32 %v530_v43, %v1711_v6 }
 0x172   : > { %v1207_v41 = vpop.eup %1206  ;;  %881 = vst [vmem:[%s1805_s17 + $0xb0] sm:$0xff] %v849_v3  ;;  %v818_v46 = vmul.f32 %v1205_v60, %v786_v4  ;;  %1228 = vpow2.f32 %v1028_v57  ;;  %v548_v58 = vmax.f32 %v403_v13, 0.0  ;;  %v1013_v36 = vmul.f32 -1.442695, %v435_v30 }
 0x173   : > { %v1209_v61 = vpop.eup %1208  ;;  %v834_v42 = vadd.f32 %v802_v18, %v1621_v47  ;;  %v677_v32 = vadd.f32 1.0, %v1207_v41  ;;  %v787_v17 = vsub.f32 %v563_v21, %v1634_v50  ;;  %v1029_v8 = vmul.f32 -1.442695, %v531_v31 }
 0x174   : > { %v1211_v5 = vpop.eup %1210  ;;  %v850_v39 = vadd.f32 %v818_v46, %v1624_v48  ;;  %v803_v15 = vmul.f32 %v1209_v61, %v771_v45  ;;  %v564_v40 = vmax.f32 %v499_v12, 0.0  ;;  %v441_v59 = vadd.f32 %v440_v24, %v1711_v6 }
 0x175   : > { %v1213_v63 = vpop.eup %1212  ;;  %866 = vst [vmem:[%s1805_s17 + $0x38] sm:$0xff] %v834_v42  ;;  %1230 = vrcp.f32 %v677_v32  ;;  %v693_v23 = vadd.f32 1.0, %v1211_v5  ;;  %v772_v43 = vsub.f32 %v548_v58, %v1641_v51  ;;  %v537_v44 = vadd.f32 %v536_v62, %v1711_v6 }
 0x176   : > { %v1215_v47 = vpop.eup %1214  ;;  %882 = vst [vmem:[%s1805_s17 + $0xb8] sm:$0xff] %v850_v39  ;;  %v835_v9 = vadd.f32 %v803_v15, %v1631_v49  ;;  %v678_v29 = vadd.f32 1.0, %v1213_v63  ;;  %1232 = vpow2.f32 %v1013_v36  ;;  %v409_v49 = vadd.f32 %v1799_v2, %v1739_v16 }
 0x177   : > { %v1217_v48 = vpop.eup %1216  ;;  %v819_v37 = vmul.f32 %v1215_v47, %v787_v17  ;;  %1234 = vrcp.f32 %v693_v23  ;;  %v1014_v22 = vmul.f32 -1.442695, %v441_v59  ;;  %v788_v38 = vsub.f32 %v564_v40, %v1644_v52 }
 0x178   : > { %867 = vst [vmem:[%s1805_s17 + $0x40] sm:$0xff] %v835_v9  ;;  %1236 = vrcp.f32 %v678_v29  ;;  %v694_v33 = vadd.f32 1.0, %v1217_v48  ;;  %v1219_v11 = vpop.eup %1218  ;;  %v1030_v13 = vmul.f32 -1.442695, %v537_v44  ;;  %v505_v6 = vadd.f32 %v1801_v26, %v1739_v16 }
 0x179   : > { %v851_v28 = vadd.f32 %v819_v37, %v1634_v50  ;;  %1238 = vpow2.f32 %v1029_v8  ;;  %v679_v3 = vadd.f32 1.0, %v1219_v11  ;;  %v415_v2 = vadd.f32 %v1820_v19, %v1739_v16 }
 0x17a   : > { %v1221_v4 = vpop.eup %1220  ;;  %1240 = vrcp.f32 %v694_v33  ;;  %v549_v45 = vmax.f32 %v409_v49, 0.0  ;;  %v511_v41 = vadd.f32 %v1822_v27, %v1739_v16  ;;  %v565_v26 = vmax.f32 %v505_v6, 0.0  ;;  %v2074_v33 = vld [vmem:[#allocation11_spill] sm:$0xff] }
 0x17b   : > { %v1223_v0 = vpop.eup %1222  ;;  %883 = vst [vmem:[%s1805_s17 + $0xc0] sm:$0xff] %v851_v28  ;;  %v804_v57 = vmul.f32 %v1221_v4, %v772_v43  ;;  %1242 = vpow2.f32 %v1014_v22  ;;  %v550_v31 = vmax.f32 %v415_v2, 0.0  ;;  %v421_v19 = vadd.f32 %v1833_v25, %v1739_v16  ;;  %v2075_v4 = vld [vmem:[#allocation12_spill] sm:$0xff] }
 0x17c   : > { %v1225_v50 = vpop.eup %1224  ;;  %v820_v60 = vmul.f32 %v1223_v0, %v788_v38  ;;  %1244 = vrcp.f32 %v679_v3  ;;  %v566_v5 = vmax.f32 %v511_v41, 0.0  ;;  %v789_v27 = vsub.f32 %v565_v26, %v1654_v54 }
 0x17d   : > { %v836_v18 = vadd.f32 %v804_v57, %v1641_v51  ;;  %v695_v21 = vadd.f32 1.0, %v1225_v50  ;;  %1246 = vpow2.f32 %v1030_v13  ;;  %v773_v51 = vsub.f32 %v549_v45, %v1651_v53 }
 0x17e   : > { %v852_v30 = vadd.f32 %v820_v60, %v1644_v52  ;;  %v1227_v46 = vpop.eup %1226  ;;  %v517_v15 = vadd.f32 %v1835_v34, %v1739_v16  ;;  %v774_v36 = vsub.f32 %v550_v31, %v1661_v55  ;;  %v551_v25 = vmax.f32 %v421_v19, 0.0  ;;  %v2078_v31 = vld [vmem:[#allocation15_spill] sm:$0xff] }
 0x17f   : > { %868 = vst [vmem:[%s1805_s17 + $0x48] sm:$0xff] %v836_v18  ;;  %1248 = vrcp.f32 %v695_v21  ;;  %v1229_v12 = vpop.eup %1228  ;;  %v680_v61 = vadd.f32 1.0, %v1227_v46  ;;  %v790_v62 = vsub.f32 %v566_v5, %v1664_v56  ;;  %v427_v9 = vadd.f32 %v1851_v1, %v1739_v16  ;;  %v2077_v18 = vld [vmem:[#allocation14_spill] sm:$0xff] }
 0x180   : > { %884 = vst [vmem:[%s1805_s17 + $0xc8] sm:$0xff] %v852_v30  ;;  %v696_v42 = vadd.f32 1.0, %v1229_v12  ;;  %v567_v29 = vmax.f32 %v517_v15, 0.0  ;;  %v523_v48 = vadd.f32 %v1853_v7, %v1739_v16  ;;  %v775_v44 = vsub.f32 %v551_v25, %v2074_v33  ;;  %v2081_v25 = vld [vmem:[#allocation18_spill] sm:$0xff] }
 0x181   : > { %1250 = vrcp.f32 %v680_v61  ;;  %v552_v22 = vmax.f32 %v427_v9, 0.0  ;;  %v433_v7 = vadd.f32 %v1869_v35, %v1739_v16  ;;  %v529_v6 = vadd.f32 %v1875_v14, %v1739_v16 }
 0x182   : > { %v1231_v32 = vpop.eup %1230  ;;  %1252 = vrcp.f32 %v696_v42  ;;  %v568_v38 = vmax.f32 %v523_v48, 0.0  ;;  %v439_v21 = vadd.f32 %v1893_v10, %v1739_v16  ;;  %v535_v26 = vadd.f32 %v1898_v20, %v1739_v16 }
 0x183   : > { %v1233_v52 = vpop.eup %1232  ;;  %v805_v39 = vmul.f32 %v1231_v32, %v773_v51  ;;  %v553_v60 = vmax.f32 %v433_v7, 0.0  ;;  %v569_v14 = vmax.f32 %v529_v6, 0.0  ;;  %v2079_v32 = vld [vmem:[#allocation16_spill] sm:$0xff] }
 0x184   : > { %v1235_v58 = vpop.eup %1234  ;;  %v681_v24 = vadd.f32 1.0, %v1233_v52  ;;  %v792_v45 = vsub.f32 %v568_v38, %v2077_v18  ;;  %v554_v42 = vmax.f32 %v439_v21, 0.0  ;;  %v570_v52 = vmax.f32 %v535_v26, 0.0 }
 0x185   : > { %v1237_v63 = vpop.eup %1236  ;;  %v837_v17 = vadd.f32 %v805_v39, %v1651_v53  ;;  %v821_v23 = vmul.f32 %v1235_v58, %v789_v27  ;;  %v777_v19 = vsub.f32 %v553_v60, %v2078_v31  ;;  %v793_v5 = vsub.f32 %v569_v14, %v2079_v32  ;;  %v2080_v39 = vld [vmem:[#allocation17_spill] sm:$0xff] }
 0x186   : > { %v1239_v8 = vpop.eup %1238  ;;  %v806_v47 = vmul.f32 %v1237_v63, %v774_v36  ;;  %1254 = vrcp.f32 %v681_v24  ;;  %v778_v15 = vsub.f32 %v554_v42, %v2080_v39  ;;  %v794_v24 = vsub.f32 %v570_v52, %v2081_v25 }
 0x187   : > { %v1241_v34 = vpop.eup %1240  ;;  %869 = vst [vmem:[%s1805_s17 + $0x50] sm:$0xff] %v837_v17  ;;  %v853_v40 = vadd.f32 %v821_v23, %v1654_v54  ;;  %v697_v53 = vadd.f32 1.0, %v1239_v8 }
 0x188   : > { %v1243_v37 = vpop.eup %1242  ;;  %v838_v59 = vadd.f32 %v806_v47, %v1661_v55  ;;  %v822_v43 = vmul.f32 %v1241_v34, %v790_v62  ;;  %v791_v55 = vsub.f32 %v567_v29, %v2075_v4 }
 0x189   : > { %v1245_v11 = vpop.eup %1244  ;;  %885 = vst [vmem:[%s1805_s17 + $0xd0] sm:$0xff] %v853_v40  ;;  %1256 = vrcp.f32 %v697_v53  ;;  %v682_v1 = vadd.f32 1.0, %v1243_v37 }
 0x18a   : > { %v1247_v28 = vpop.eup %1246  ;;  %870 = vst [vmem:[%s1805_s17 + $0x58] sm:$0xff] %v838_v59  ;;  %v854_v54 = vadd.f32 %v822_v43, %v1664_v56  ;;  %v807_v49 = vmul.f32 %v1245_v11, %v775_v44  ;;  %v2076_v56 = vld [vmem:[#allocation13_spill] sm:$0xff] }
 0x18b   : > { %1258 = vrcp.f32 %v682_v1  ;;  %v698_v3 = vadd.f32 1.0, %v1247_v28  ;;  %v776_v50 = vsub.f32 %v552_v22, %v2076_v56 }
 0x18c   : > { %v1249_v13 = vpop.eup %1248  ;;  %886 = vst [vmem:[%s1805_s17 + $0xd8] sm:$0xff] %v854_v54  ;;  %v839_v0 = vadd.f32 %v807_v49, %v2074_v33 }
 0x18d   : > { %v823_v57 = vmul.f32 %v1249_v13, %v791_v55  ;;  %1260 = vrcp.f32 %v698_v3 }
 0x18e   : > { %871 = vst [vmem:[%s1805_s17 + $0x60] sm:$0xff] %v839_v0  ;;  %v1251_v35 = vpop.eup %1250 }
 0x18f   : > { %v855_v2 = vadd.f32 %v823_v57, %v2075_v4  ;;  %v1253_v30 = vpop.eup %1252  ;;  %v808_v41 = vmul.f32 %v1251_v35, %v776_v50 }
 0x190   : > { %v824_v46 = vmul.f32 %v1253_v30, %v792_v45 }
 0x191   : > { %887 = vst [vmem:[%s1805_s17 + $0xe0] sm:$0xff] %v855_v2  ;;  %v840_v12 = vadd.f32 %v808_v41, %v2076_v56 }
 0x192   : > { %v856_v51 = vadd.f32 %v824_v46, %v2077_v18 }
 0x193   : > { %v1255_v61 = vpop.eup %1254  ;;  %872 = vst [vmem:[%s1805_s17 + $0x68] sm:$0xff] %v840_v12 }
 0x194   : > { %v809_v10 = vmul.f32 %v1255_v61, %v777_v19  ;;  %888 = vst [vmem:[%s1805_s17 + $0xe8] sm:$0xff] %v856_v51 }
 0x196   : > { %v1257_v27 = vpop.eup %1256  ;;  %v841_v16 = vadd.f32 %v809_v10, %v2078_v31 }
 0x197   : > { %v825_v20 = vmul.f32 %v1257_v27, %v793_v5 }
 0x198   : > { %v1259_v58 = vpop.eup %1258  ;;  %873 = vst [vmem:[%s1805_s17 + $0x70] sm:$0xff] %v841_v16 }
 0x199   : > { %v857_v36 = vadd.f32 %v825_v20, %v2079_v32  ;;  %v810_v63 = vmul.f32 %v1259_v58, %v778_v15 }
 0x19a   : > { %v1261_v17 = vpop.eup %1260 }
 0x19b   : > { %889 = vst [vmem:[%s1805_s17 + $0xf0] sm:$0xff] %v857_v36  ;;  %v842_v23 = vadd.f32 %v810_v63, %v2080_v39  ;;  %v826_v8 = vmul.f32 %v1261_v17, %v794_v24 }
 0x19d   : > { %874 = vst [vmem:[%s1805_s17 + $0x78] sm:$0xff] %v842_v23  ;;  %v858_v62 = vadd.f32 %v826_v8, %v2081_v25 }
 0x19f   : > { %890 = vst [vmem:[%s1805_s17 + $0xf8] sm:$0xff] %v858_v62 }
 0x1a0   : > { %1329 = shalt.err (!%p1326_p0)
}
 0x1a1   : > { %s1330_s11 = scalar_lea.hbm %s1983_s4, 4096  ;;  %s1334_s28 = scalar_lea.hbm %s2034_s3, 8192 }
 0x1a2   : > { %p1331_p5 = scmp.ne.s32.totalorder %s1983_s4, %s1330_s11  ;;  %p1335_p4 = scmp.lt.s32.totalorder %s1983_s4, %s2034_s3 }
 0x1a3   : > { %p1336_p6 = scmp.lt.s32.totalorder %s1334_s28, %s1330_s11 }
 0x1a4   : > { %p1332_p9 = pnand %p1331_p5, %p2082_p11 }
 0x1a5   : > { %p1337_p8 = por %p1336_p6, %p1335_p4 }
 0x1a6   : > { %p1333_p1 = pneg %p1332_p9 }
 0x1a8   : > { %p1338_p3 = pnand %p1337_p8, %p1333_p1 }
 0x1aa   : > { %1341 = shalt.err (!%p1338_p3)
}
 0x1ab   : > { %s1394_s20 = smov 128   ;;  %s1395_s17 = smov 8  }
 0x1ac   : > { %1076 = dma.vmem_to_hbm [thread:$0]  (%p2082_p11), %s1985_s23, 4096, %s1983_s4, %s892_s16, %s1394_s20, %s1394_s20, %s1395_s17  }
 0x1ad PF: > { %s920_s22 = sand.u32 1, %s1372_s12   ;;  %p2083_p7 = scmp.ne.s32.totalorder %s2056_s19, 0 }
 0x1ae   : > { %p2084_p12 = scmp.ge.s32.totalorder %s1384_s15, 2  ;;  %s921_s25 = scalar_lea.sflag [#allocation4], %s920_s22 }
 0x1b0   : > { %p1087_p10 = pnand %p2084_p12, %p2083_p7 }
 0x1b2   : > { %p1088_p2 = pneg %p1087_p10 }
 0x1b4   : > { %1367 = dma.done.wait (%p1088_p2), %s921_s25, 4096  }
 0x1b5   : > { %1369 = vsyncadd (%p1088_p2), %s921_s25, 4294963200  ;;  %p17_p13 = scmp.ge.s32.totalorder %s1470_s24, 4   ;;  %s2085_s12 = smov %s1376_s13 }
 0x1b6   : > { %s2086_s13 = smov %s1380_s14  ;;  %s2087_s14 = smov %s1487_s5 }
 0x1b7   : > { %s2088_s15 = smov %s1470_s24  ;;  %19 = sbr.rel (!%p17_p13) target bundleno = 6 (0x6), region = 81 }
 0x1bc   :  { %926 = vsyncpa [#allocation3], 1 }
 0x1bd   :  { %928 = vsyncpa [#allocation3 + $0x1], 1 }
 0x1be   :  { %929 = vsyncpa [#allocation6], 1 }
 0x1bf   :  { %930 = vsyncpa [#allocation4], 1 }
 0x1c0   :  { %932 = vsyncpa [#allocation4 + $0x1], 1 }

</bundles_post_ra>
